<compile_context>
chip_gen: v6e
topology: v6e:2x2x1
jax: 0.10.0
libtpu: 0.0.40
codegen_flags: <defaults>
</compile_context>

<pallas_src>
import jax
import jax.numpy as jnp
from jax.experimental import pallas as pl
from jax.experimental.pallas import tpu as pltpu


def _round_up(x, m):
    return ((x + m - 1) // m) * m


def _round_down(x, m):
    return (x // m) * m


def mlp_kernel(x_ref, w1_ref, b1_ref, w2_ref, b2_ref, w3_ref, b3_ref, o_ref):
    # Fused 3-layer MLP on one [bt, F] tile. All matmuls hit the MXU with f32
    # accumulation; bias-add + relu are VPU filler under the MXU slot.
    # In-kernel cast to the matmul dtype: no extra wrapper-side HBM pass.
    x = x_ref[...].astype(w1_ref.dtype)

    h1 = jnp.dot(x, w1_ref[...], preferred_element_type=jnp.float32)
    h1 = jnp.maximum(h1 + b1_ref[...], 0.0).astype(w2_ref.dtype)  # relu(dropout(.)), eval

    h2 = jnp.dot(h1, w2_ref[...], preferred_element_type=jnp.float32)
    h2 = jnp.maximum(h2 + b2_ref[...], 0.0).astype(w3_ref.dtype)

    out = jnp.dot(h2, w3_ref[...], preferred_element_type=jnp.float32)
    o_ref[...] = (out + b3_ref[...]).astype(o_ref.dtype)


def prepare_params(params, compute_dtype=None):
    """One-time, per-model preparation (do NOT call per forward):
      * pad the classifier head from C to a multiple of 128 lanes (zero columns)
        so the third matmul is a full MXU tile and stores are unmasked,
      * optionally cast the weights once to `compute_dtype` (bf16 fast path on
        v5e/v6e/v7x).  Biases stay f32 (added to the f32 accumulator)."""
    w1, b1 = params["w1"], params["b1"]   # [F, 128],   [1, 128]
    w2, b2 = params["w2"], params["b2"]   # [128, 128], [1, 128]
    w3, b3 = params["w3"], params["b3"]   # [128, C],   [1, C]
    C = w3.shape[1]
    C_pad = _round_up(max(C, 128), 128)
    if C_pad != C:
        w3 = jnp.pad(w3, ((0, 0), (0, C_pad - C)))   # padded columns are exact zeros
        b3 = jnp.pad(b3, ((0, 0), (0, C_pad - C)))
    if compute_dtype is not None:
        w1 = w1.astype(compute_dtype)
        w2 = w2.astype(compute_dtype)
        w3 = w3.astype(compute_dtype)
    return {"w1": w1, "b1": b1, "w2": w2, "b2": b2, "w3": w3, "b3": b3,
            "num_classes": C}


def linear_mlp_forward(x, prepared, *, batch_tile=1024, out_dtype=jnp.float32,
                       return_padded=False):
    """x: [B, input_feature] (f32 or bf16).  prepared: output of prepare_params.

    For the bf16 fast path store x in bf16 at the producer (halves the dominant
    HBM read); if x arrives f32 it is cast inside the kernel instead of via a
    separate wrapper-side astype pass.
    """
    B, F = x.shape
    w1, b1 = prepared["w1"], prepared["b1"]
    w2, b2 = prepared["w2"], prepared["b2"]
    w3, b3 = prepared["w3"], prepared["b3"]
    C = prepared["num_classes"]
    C_pad = w3.shape[1]

    matmul_dtype = w1.dtype
    # bf16 packs (16,128) per vreg, f32 packs (8,128): keep tile rows aligned so
    # the x tile never needs an in-tile relayout.
    row_align = 16 if matmul_dtype == jnp.bfloat16 else 8

    # --- batch tile sizing (HBM / grid-overhead bound: go big) ----------------
    bt = min(batch_tile, _round_up(B, row_align))
    # v7x: keep >= 2 (even) grid steps so both TensorCores get work.
    if B >= 512:
        half = _round_down(_round_up(B, row_align) // 2, 256)
        if half >= 256:
            bt = min(bt, half)
    bt = max(row_align, _round_up(bt, row_align))

    B_pad = _round_up(B, bt)
    if B_pad != B:
        x = jnp.pad(x, ((0, B_pad - B), (0, 0)))
    grid = (B_pad // bt,)

    # --- explicit VMEM budget (matters on v5e when tiles are pushed large) ----
    x_bytes = bt * F * jnp.dtype(x.dtype).itemsize
    o_bytes = bt * C_pad * jnp.dtype(out_dtype).itemsize
    param_bytes = sum(int(a.size) * jnp.dtype(a.dtype).itemsize
                      for a in (w1, b1, w2, b2, w3, b3))
    needed = 2 * (x_bytes + o_bytes) + 2 * param_bytes + (8 << 20)  # dbl-buffer + slack
    vmem_limit = int(min(max(needed, 16 << 20), 64 << 20))

    def batch_map(i):
        return (i, 0)

    def fixed_map(i):
        return (0, 0)

    out = pl.pallas_call(
        mlp_kernel,
        out_shape=jax.ShapeDtypeStruct((B_pad, C_pad), out_dtype),
        grid_spec=pltpu.PrefetchScalarGridSpec(
            num_scalar_prefetch=0,
            grid=grid,
            in_specs=[
                pl.BlockSpec((bt, F), batch_map),    # x tile: streamed over batch
                pl.BlockSpec(w1.shape, fixed_map),   # weights/biases: constant
                pl.BlockSpec(b1.shape, fixed_map),   # index_map -> stay resident,
                pl.BlockSpec(w2.shape, fixed_map),   # never re-DMA'd
                pl.BlockSpec(b2.shape, fixed_map),
                pl.BlockSpec(w3.shape, fixed_map),
                pl.BlockSpec(b3.shape, fixed_map),
            ],
            out_specs=pl.BlockSpec((bt, C_pad), batch_map),
        ),
        compiler_params=pltpu.CompilerParams(
            dimension_semantics=("parallel",),
            vmem_limit_bytes=vmem_limit),
    )(x, w1, b1, w2, b2, w3, b3)

    if return_padded:
        return out                     # [B_pad, C_pad]; columns >= C are exact zeros
    return out[:B, :C]


def init_params(key, input_feature=256, num_classes=10):
    """Deterministic init mimicking nn.Linear's uniform(-1/sqrt(in), 1/sqrt(in)).
    Weights stored transposed ([in, out]) for the kernel; all f32."""
    def make_layer(k, fan_in, fan_out):
        kw, kb = jax.random.split(k)
        bound = 1.0 / jnp.sqrt(fan_in)
        w = jax.random.uniform(kw, (fan_in, fan_out), jnp.float32, -bound, bound)
        b = jax.random.uniform(kb, (1, fan_out), jnp.float32, -bound, bound)
        return w, b

    k1, k2, k3 = jax.random.split(key, 3)
    w1, b1 = make_layer(k1, input_feature, 128)
    w2, b2 = make_layer(k2, 128, 128)
    w3, b3 = make_layer(k3, 128, num_classes)
    return {"w1": w1, "b1": b1, "w2": w2, "b2": b2, "w3": w3, "b3": b3}


if __name__ == "__main__":
    key = jax.random.PRNGKey(0)
    k_param, k_x = jax.random.split(key)

    input_feature = 256
    num_classes = 10
    batch = 64          # small test shape; kernel scales to large B via batch tiling

    params = init_params(k_param, input_feature, num_classes)
    x = jax.random.normal(k_x, (batch, input_feature), jnp.float32)

    # Reference (eval-mode forward: dropout = identity), plain JAX.
    ref = jnp.maximum(x @ params["w1"] + params["b1"], 0.0)
    ref = jnp.maximum(ref @ params["w2"] + params["b2"], 0.0)
    ref = ref @ params["w3"] + params["b3"]

    # f32 path.
    prep_f32 = prepare_params(params)
    out = jax.block_until_ready(linear_mlp_forward(x, prep_f32))
    assert out.shape == (batch, num_classes)
    assert jnp.allclose(out, ref, atol=1e-4, rtol=1e-4)

    # Ragged batch (exercises batch padding / row alignment).
    out_r = jax.block_until_ready(linear_mlp_forward(x[:50], prep_f32))
    assert out_r.shape == (50, num_classes)
    assert jnp.allclose(out_r, ref[:50], atol=1e-4, rtol=1e-4)

    # bf16 fast path: weights pre-cast once; x stored in bf16 by the producer;
    # bf16 output halves writeback. f32 accumulation inside the kernel.
    prep_bf16 = prepare_params(params, compute_dtype=jnp.bfloat16)
    x_bf16 = x.astype(jnp.bfloat16)    # stands in for a producer that emits bf16
    out_bf16 = jax.block_until_ready(
        linear_mlp_forward(x_bf16, prep_bf16, out_dtype=jnp.bfloat16))
    assert out_bf16.shape == (batch, num_classes)
    assert float(jnp.max(jnp.abs(out_bf16.astype(jnp.float32) - ref))) < 0.1

    print("KERNEL_OK")
</pallas_src>

<mosaic_0001>
module attributes {stable_mosaic.version = 11 : i64} {
  func.func @mlp_kernel(%arg0: i32, %arg1: memref<64x256xf32, #tpu.memory_space<vmem>>, %arg2: memref<256x128xf32, #tpu.memory_space<vmem>>, %arg3: memref<1x128xf32, #tpu.memory_space<vmem>>, %arg4: memref<128x128xf32, #tpu.memory_space<vmem>>, %arg5: memref<1x128xf32, #tpu.memory_space<vmem>>, %arg6: memref<128x128xf32, #tpu.memory_space<vmem>>, %arg7: memref<1x128xf32, #tpu.memory_space<vmem>>, %arg8: memref<64x128xf32, #tpu.memory_space<vmem>>) attributes {dimension_semantics = [#tpu.dimension_semantics<parallel>], iteration_bounds = array<i64: 1>, scalar_prefetch = 0 : i64, scratch_operands = 0 : i64, tpu.core_type = #tpu.core_type<tc>, window_params = [{transform_indices = @transform_0, window_bounds = array<i64: 64, 256>}, {pipeline_mode = #tpu.pipeline_mode<synchronous>, transform_indices = @transform_1, window_bounds = array<i64: 256, 128>}, {pipeline_mode = #tpu.pipeline_mode<synchronous>, transform_indices = @transform_2, window_bounds = array<i64: 1, 128>}, {pipeline_mode = #tpu.pipeline_mode<synchronous>, transform_indices = @transform_3, window_bounds = array<i64: 128, 128>}, {pipeline_mode = #tpu.pipeline_mode<synchronous>, transform_indices = @transform_4, window_bounds = array<i64: 1, 128>}, {pipeline_mode = #tpu.pipeline_mode<synchronous>, transform_indices = @transform_5, window_bounds = array<i64: 128, 128>}, {pipeline_mode = #tpu.pipeline_mode<synchronous>, transform_indices = @transform_6, window_bounds = array<i64: 1, 128>}, {transform_indices = @transform_7, window_bounds = array<i64: 64, 128>}]} {
    %c0 = arith.constant 0 : index
    %c0_0 = arith.constant 0 : index
    %0 = vector.load %arg1[%c0, %c0_0] : memref<64x256xf32, #tpu.memory_space<vmem>>, vector<64x256xf32>
    %c0_1 = arith.constant 0 : index
    %c0_2 = arith.constant 0 : index
    %1 = vector.load %arg2[%c0_1, %c0_2] : memref<256x128xf32, #tpu.memory_space<vmem>>, vector<256x128xf32>
    %cst = arith.constant dense<0.000000e+00> : vector<64x128xf32>
    %2 = tpu.matmul %0, %1, %cst {dimension_numbers = #tpu.dot_dimension_numbers<[1], [0], [0], [1], [0, 0, 1, 1], [], []>} : vector<64x256xf32>, vector<256x128xf32>, vector<64x128xf32> -> vector<64x128xf32>
    %c0_3 = arith.constant 0 : index
    %c0_4 = arith.constant 0 : index
    %3 = vector.load %arg3[%c0_3, %c0_4] : memref<1x128xf32, #tpu.memory_space<vmem>>, vector<1x128xf32>
    %4 = vector.broadcast %3 : vector<1x128xf32> to vector<64x128xf32>
    %5 = arith.addf %2, %4 : vector<64x128xf32>
    %cst_5 = arith.constant 0.000000e+00 : f32
    %6 = vector.broadcast %cst_5 : f32 to vector<64x128xf32>
    %7 = arith.maximumf %5, %6 : vector<64x128xf32>
    %c0_6 = arith.constant 0 : index
    %c0_7 = arith.constant 0 : index
    %8 = vector.load %arg4[%c0_6, %c0_7] : memref<128x128xf32, #tpu.memory_space<vmem>>, vector<128x128xf32>
    %cst_8 = arith.constant dense<0.000000e+00> : vector<64x128xf32>
    %9 = tpu.matmul %7, %8, %cst_8 {dimension_numbers = #tpu.dot_dimension_numbers<[1], [0], [0], [1], [0, 0, 1, 1], [], []>} : vector<64x128xf32>, vector<128x128xf32>, vector<64x128xf32> -> vector<64x128xf32>
    %c0_9 = arith.constant 0 : index
    %c0_10 = arith.constant 0 : index
    %10 = vector.load %arg5[%c0_9, %c0_10] : memref<1x128xf32, #tpu.memory_space<vmem>>, vector<1x128xf32>
    %11 = vector.broadcast %10 : vector<1x128xf32> to vector<64x128xf32>
    %12 = arith.addf %9, %11 : vector<64x128xf32>
    %cst_11 = arith.constant 0.000000e+00 : f32
    %13 = vector.broadcast %cst_11 : f32 to vector<64x128xf32>
    %14 = arith.maximumf %12, %13 : vector<64x128xf32>
    %c0_12 = arith.constant 0 : index
    %c0_13 = arith.constant 0 : index
    %15 = vector.load %arg6[%c0_12, %c0_13] : memref<128x128xf32, #tpu.memory_space<vmem>>, vector<128x128xf32>
    %cst_14 = arith.constant dense<0.000000e+00> : vector<64x128xf32>
    %16 = tpu.matmul %14, %15, %cst_14 {dimension_numbers = #tpu.dot_dimension_numbers<[1], [0], [0], [1], [0, 0, 1, 1], [], []>} : vector<64x128xf32>, vector<128x128xf32>, vector<64x128xf32> -> vector<64x128xf32>
    %c0_15 = arith.constant 0 : index
    %c0_16 = arith.constant 0 : index
    %17 = vector.load %arg7[%c0_15, %c0_16] : memref<1x128xf32, #tpu.memory_space<vmem>>, vector<1x128xf32>
    %18 = vector.broadcast %17 : vector<1x128xf32> to vector<64x128xf32>
    %19 = arith.addf %16, %18 : vector<64x128xf32>
    %c0_17 = arith.constant 0 : index
    %c0_18 = arith.constant 0 : index
    %20 = vector.load %arg8[%c0_17, %c0_18] : memref<64x128xf32, #tpu.memory_space<vmem>>, vector<64x128xf32>
    tpu.vector_store %arg8[%c0_17, %c0_18], %19 {strides = array<i32>} : memref<64x128xf32, #tpu.memory_space<vmem>>, vector<64x128xf32>,
    return
  }
  func.func @transform_0(%arg0: i32) -> (i32, i32) {
    %c0_i32 = arith.constant 0 : i32
    %c0_i32_0 = arith.constant 0 : i32
    return %arg0, %c0_i32 : i32, i32
  }
  func.func @transform_1(%arg0: i32) -> (i32, i32) {
    %c0_i32 = arith.constant 0 : i32
    %c0_i32_0 = arith.constant 0 : i32
    %c0_i32_1 = arith.constant 0 : i32
    return %c0_i32, %c0_i32_0 : i32, i32
  }
  func.func @transform_2(%arg0: i32) -> (i32, i32) {
    %c0_i32 = arith.constant 0 : i32
    %c0_i32_0 = arith.constant 0 : i32
    %c0_i32_1 = arith.constant 0 : i32
    return %c0_i32, %c0_i32_0 : i32, i32
  }
  func.func @transform_3(%arg0: i32) -> (i32, i32) {
    %c0_i32 = arith.constant 0 : i32
    %c0_i32_0 = arith.constant 0 : i32
    %c0_i32_1 = arith.constant 0 : i32
    return %c0_i32, %c0_i32_0 : i32, i32
  }
  func.func @transform_4(%arg0: i32) -> (i32, i32) {
    %c0_i32 = arith.constant 0 : i32
    %c0_i32_0 = arith.constant 0 : i32
    %c0_i32_1 = arith.constant 0 : i32
    return %c0_i32, %c0_i32_0 : i32, i32
  }
  func.func @transform_5(%arg0: i32) -> (i32, i32) {
    %c0_i32 = arith.constant 0 : i32
    %c0_i32_0 = arith.constant 0 : i32
    %c0_i32_1 = arith.constant 0 : i32
    return %c0_i32, %c0_i32_0 : i32, i32
  }
  func.func @transform_6(%arg0: i32) -> (i32, i32) {
    %c0_i32 = arith.constant 0 : i32
    %c0_i32_0 = arith.constant 0 : i32
    %c0_i32_1 = arith.constant 0 : i32
    return %c0_i32, %c0_i32_0 : i32, i32
  }
  func.func @transform_7(%arg0: i32) -> (i32, i32) {
    %c0_i32 = arith.constant 0 : i32
    %c0_i32_0 = arith.constant 0 : i32
    return %arg0, %c0_i32 : i32, i32
  }
}

</mosaic_0001>

<bundles_post_ra>
// kernel: tpu_custom_call.1
= control target key start
LH: loop header
LB: loop body
LE: loop exit
PB: predicated region body
PF: predicated region fallthrough
CT: control target
= control target key end

     0   :  { %12 = vsyncpa [#allocation3], 0  ;;  %s1018_s0 = inlined_call_operand.hbm [shape: f32[64,256], index: 0, kind: input, shape index: {}]   ;;  %s1019_s1 = inlined_call_operand.hbm [shape: f32[256,128], index: 1, kind: input, shape index: {}]   ;;  %s1020_s2 = inlined_call_operand.vmem [shape: f32[1,128], index: 2, kind: input, shape index: {}]   ;;  %s1021_s3 = inlined_call_operand.hbm [shape: f32[128,128], index: 3, kind: input, shape index: {}]   ;;  %s1022_s4 = inlined_call_operand.vmem [shape: f32[1,128], index: 4, kind: input, shape index: {}]   ;;  %s1023_s5 = inlined_call_operand.hbm [shape: f32[128,128], index: 5, kind: input, shape index: {}]   ;;  %s1024_s6 = inlined_call_operand.vmem [shape: f32[1,128], index: 6, kind: input, shape index: {}]   ;;  %s1025_s7 = inlined_call_operand.hbm [shape: f32[64,128], index: 7, kind: output, shape index: {}]  }
   0x1   :  { %13 = vsyncpa [#allocation6], 0 }
   0x2   :  { %14 = vsyncpa [#allocation9], 0 }
   0x3   :  { %15 = vsyncpa [#allocation4], 0  ;;  %s885_s24 = smov [#allocation5]  }
   0x4   :  { %s33_s25 = sshll.u32 %s885_s24, 4  ;;  %s34_s25 = int_to_ptr.vmem [resolvable:$true] %s33_s25 }
   0x5   :  { %s785_s26 = scalar_lea.vmem %s34_s25, 4096  ;;  %p790_p1 = scmp.lt.s32.totalorder %s34_s25, %s34_s25 }
   0x6   :  { %p786_p0 = scmp.ne.s32.totalorder %s34_s25, %s785_s26  ;;  %p791_p2 = scmp.lt.s32.totalorder %s785_s26, %s785_s26 }
   0x8   :  { %p792_p3 = por %p791_p2, %p790_p1 }
   0xa   :  { %p793_p4 = pnand %p792_p3, %p786_p0 }
   0xc   :  { %796 = shalt.err (!%p793_p4)
}
   0xd   :  { %s886_s27 = smov 128   ;;  %s887_s28 = smov 8  }
   0xe   :  { %39 = dma.hbm_to_vmem [thread:$0]  %s1019_s1, 4096, %s34_s25, [#allocation6], %s886_s27, %s886_s27, %s887_s28  }
   0xf   :  { %s888_s8 = smov [#allocation2]  }
  0x10   :  { %s21_s9 = sshll.u32 %s888_s8, 4  ;;  %s22_s9 = int_to_ptr.vmem [resolvable:$true] %s21_s9 }
  0x11   :  { %s805_s10 = scalar_lea.vmem %s22_s9, 2048  ;;  %p810_p6 = scmp.lt.s32.totalorder %s22_s9, %s22_s9 }
  0x12   :  { %p806_p5 = scmp.ne.s32.totalorder %s22_s9, %s805_s10  ;;  %p811_p7 = scmp.lt.s32.totalorder %s805_s10, %s805_s10 }
  0x14   :  { %p812_p8 = por %p811_p7, %p810_p6 }
  0x16   :  { %p813_p9 = pnand %p812_p8, %p806_p5 }
  0x18   :  { %816 = shalt.err (!%p813_p9)
}
  0x19   :  { %s889_s11 = smov 256   ;;  %s890_s12 = smov 16  }
  0x1a   :  { %27 = dma.hbm_to_vmem [thread:$0]  %s1018_s0, 2048, %s22_s9, [#allocation3], %s889_s11, %s889_s11, %s890_s12  }
  0x1b   :  { %s891_s15 = smov [#allocation7]   ;;  %s892_s17 = smov [#allocation8]  }
  0x1c   :  { %s47_s16 = sshll.u32 %s891_s15, 4  ;;  %s61_s1 = sshll.u32 %s892_s17, 4  ;;  %s48_s16 = int_to_ptr.vmem [resolvable:$true] %s47_s16  ;;  %s62_s1 = int_to_ptr.vmem [resolvable:$true] %s61_s1 }
  0x1d   :  { %s825_s18 = scalar_lea.vmem %s48_s16, 2048  ;;  %p830_p11 = scmp.lt.s32.totalorder %s48_s16, %s48_s16 }
  0x1e   :  { %p826_p10 = scmp.ne.s32.totalorder %s48_s16, %s825_s18  ;;  %p831_p12 = scmp.lt.s32.totalorder %s825_s18, %s825_s18 }
  0x20   :  { %p832_p13 = por %p831_p12, %p830_p11 }
  0x22   :  { %p833_p0 = pnand %p832_p13, %p826_p10 }
  0x24   :  { %836 = shalt.err (!%p833_p0)
}
  0x25   :  { %53 = dma.hbm_to_vmem [thread:$0]  %s1021_s3, 2048, %s48_s16, [#allocation6], %s886_s27, %s886_s27, %s887_s28  }
  0x26   :  { %s845_s0 = scalar_lea.vmem %s62_s1, 2048  ;;  %p850_p2 = scmp.lt.s32.totalorder %s62_s1, %s62_s1 }
  0x27   :  { %p846_p1 = scmp.ne.s32.totalorder %s62_s1, %s845_s0  ;;  %p851_p3 = scmp.lt.s32.totalorder %s845_s0, %s845_s0 }
  0x29   :  { %p852_p4 = por %p851_p3, %p850_p2 }
  0x2b   :  { %p853_p5 = pnand %p852_p4, %p846_p1 }
  0x2d   :  { %856 = shalt.err (!%p853_p5)
}
  0x2e   :  { %67 = dma.hbm_to_vmem [thread:$0]  %s1023_s5, 2048, %s62_s1, [#allocation9], %s886_s27, %s886_s27, %s887_s28  }
  0x2f   :  { %877 = dma.done.wait [#allocation3], 2048  }
  0x30   :  { %878 = vsyncadd [#allocation3], 4294965248 }
  0x31   :  { %879 = dma.done.wait [#allocation6], 6144  }
  0x32   :  { %880 = vsyncadd [#allocation6], 4294961152 }
  0x33   :  { %881 = dma.done.wait [#allocation9], 2048  }
  0x34   :  { %882 = vsyncadd [#allocation9], 4294965248  ;;  %v129_v0 = vld [vmem:[#allocation5 + $0xf8] sm:$0xff]  ;;  %v128_v2 = vld [vmem:[#allocation5 + $0xf0] sm:$0xff] }
  0x35   :  { %v113_v1 = vld [vmem:[#allocation5 + $0x78] sm:$0xff]  ;;  %544 = vmatprep.subr.mxu0 %v129_v0  ;;  %v112_v3 = vld [vmem:[#allocation5 + $0x70] sm:$0xff]  ;;  %v127_v4 = vld [vmem:[#allocation5 + $0xe8] sm:$0xff] }
  0x36   :  { %545 = vmatpush3.msra.mxu0 %v113_v1  ;;  %v111_v5 = vld [vmem:[#allocation5 + $0x68] sm:$0xff]  ;;  %v126_v6 = vld [vmem:[#allocation5 + $0xe0] sm:$0xff]  ;;  %v125_v8 = vld [vmem:[#allocation5 + $0xd8] sm:$0xff] }
  0x37   :  { %546 = vmatprep.subr.mxu0 %v128_v2  ;;  %v110_v7 = vld [vmem:[#allocation5 + $0x60] sm:$0xff]  ;;  %v109_v9 = vld [vmem:[#allocation5 + $0x58] sm:$0xff]  ;;  %v124_v10 = vld [vmem:[#allocation5 + $0xd0] sm:$0xff] }
  0x38   :  { %547 = vmatpush3.msra.mxu0 %v112_v3  ;;  %v108_v11 = vld [vmem:[#allocation5 + $0x50] sm:$0xff]  ;;  %v123_v12 = vld [vmem:[#allocation5 + $0xc8] sm:$0xff]  ;;  %v122_v15 = vld [vmem:[#allocation5 + $0xc0] sm:$0xff] }
  0x39   :  { %548 = vmatprep.subr.mxu0 %v127_v4  ;;  %v83_v13 = vld [vmem:[#allocation2 + $0x8] sm:$0xff]  ;;  %v106_v16 = vld [vmem:[#allocation5 + $0x40] sm:$0xff]  ;;  %v121_v17 = vld [vmem:[#allocation5 + $0xb8] sm:$0xff] }
  0x3a   :  { %549 = vmatpush3.msra.mxu0 %v111_v5  ;;  %v107_v14 = vld [vmem:[#allocation5 + $0x48] sm:$0xff]  ;;  %201 = vmatprep.mubr.f32.mxu0 %v83_v13  ;;  %v105_v18 = vld [vmem:[#allocation5 + $0x38] sm:$0xff]  ;;  %v120_v19 = vld [vmem:[#allocation5 + $0xb0] sm:$0xff] }
  0x3b   :  { %550 = vmatprep.subr.mxu0 %v126_v6  ;;  %v265_v20 = vld [vmem:[#allocation7 + $0x78] sm:$0xff]  ;;  %v264_v21 = vld [vmem:[#allocation7 + $0x70] sm:$0xff]  ;;  %v119_v23 = vld [vmem:[#allocation5 + $0xa8] sm:$0xff] }
  0x3c   :  { %551 = vmatpush3.msra.mxu0 %v110_v7  ;;  %v104_v22 = vld [vmem:[#allocation5 + $0x30] sm:$0xff]  ;;  %648 = vmatprep.subr.mxu1 %v265_v20  ;;  %v263_v24 = vld [vmem:[#allocation7 + $0x68] sm:$0xff]  ;;  %v118_v26 = vld [vmem:[#allocation5 + $0xa0] sm:$0xff] }
  0x3d   :  { %552 = vmatprep.subr.mxu0 %v125_v8  ;;  %649 = vmatpush3.msra.mxu1 %v265_v20  ;;  %v103_v25 = vld [vmem:[#allocation5 + $0x28] sm:$0xff]  ;;  %v262_v27 = vld [vmem:[#allocation7 + $0x60] sm:$0xff]  ;;  %v117_v29 = vld [vmem:[#allocation5 + $0x98] sm:$0xff] }
  0x3e   :  { %553 = vmatpush3.msra.mxu0 %v109_v9  ;;  %650 = vmatprep.subr.mxu1 %v264_v21  ;;  %v102_v28 = vld [vmem:[#allocation5 + $0x20] sm:$0xff]  ;;  %v261_v30 = vld [vmem:[#allocation7 + $0x58] sm:$0xff]  ;;  %v116_v32 = vld [vmem:[#allocation5 + $0x90] sm:$0xff] }
  0x3f   :  { %554 = vmatprep.subr.mxu0 %v124_v10  ;;  %651 = vmatpush3.msra.mxu1 %v264_v21  ;;  %v101_v31 = vld [vmem:[#allocation5 + $0x18] sm:$0xff]  ;;  %v260_v33 = vld [vmem:[#allocation7 + $0x50] sm:$0xff]  ;;  %v115_v35 = vld [vmem:[#allocation5 + $0x88] sm:$0xff] }
  0x40   :  { %555 = vmatpush3.msra.mxu0 %v108_v11  ;;  %652 = vmatprep.subr.mxu1 %v263_v24  ;;  %v100_v34 = vld [vmem:[#allocation5 + $0x10] sm:$0xff]  ;;  %v259_v36 = vld [vmem:[#allocation7 + $0x48] sm:$0xff]  ;;  %v114_v38 = vld [vmem:[#allocation5 + $0x80] sm:$0xff] }
  0x41   :  { %556 = vmatprep.subr.mxu0 %v123_v12  ;;  %653 = vmatpush3.msra.mxu1 %v263_v24  ;;  %v99_v37 = vld [vmem:[#allocation5 + $0x8] sm:$0xff]  ;;  %v258_v39 = vld [vmem:[#allocation7 + $0x40] sm:$0xff]  ;;  %v257_v42 = vld [vmem:[#allocation7 + $0x38] sm:$0xff] }
  0x42   :  { %557 = vmatpush3.msra.mxu0 %v107_v14  ;;  %654 = vmatprep.subr.mxu1 %v262_v27  ;;  %v98_v40 = vld [vmem:[#allocation5] sm:$0xff]  ;;  %v85_v43 = vld [vmem:[#allocation2 + $0x18] sm:$0xff]  ;;  %v256_v44 = vld [vmem:[#allocation7 + $0x30] sm:$0xff] }
  0x43   :  { %558 = vmatprep.subr.mxu0 %v122_v15  ;;  %655 = vmatpush3.msra.mxu1 %v262_v27  ;;  %v82_v41 = vld [vmem:[#allocation2] sm:$0xff]  ;;  %v84_v45 = vld [vmem:[#allocation2 + $0x10] sm:$0xff]  ;;  %v87_v46 = vld [vmem:[#allocation2 + $0x28] sm:$0xff] }
  0x44   :  { %559 = vmatpush3.msra.mxu0 %v106_v16  ;;  %656 = vmatprep.subr.mxu1 %v261_v30  ;;  %v86_v47 = vld [vmem:[#allocation2 + $0x20] sm:$0xff]  ;;  %v89_v48 = vld [vmem:[#allocation2 + $0x38] sm:$0xff]  ;;  %v88_v49 = vld [vmem:[#allocation2 + $0x30] sm:$0xff] }
  0x45   :  { %560 = vmatprep.subr.mxu0 %v121_v17  ;;  %657 = vmatpush3.msra.mxu1 %v261_v30  ;;  %v91_v50 = vld [vmem:[#allocation2 + $0x48] sm:$0xff]  ;;  %v90_v51 = vld [vmem:[#allocation2 + $0x40] sm:$0xff]  ;;  %v93_v52 = vld [vmem:[#allocation2 + $0x58] sm:$0xff] }
  0x46   :  { %561 = vmatpush3.msra.mxu0 %v105_v18  ;;  %658 = vmatprep.subr.mxu1 %v260_v33  ;;  %v92_v53 = vld [vmem:[#allocation2 + $0x50] sm:$0xff]  ;;  %v95_v54 = vld [vmem:[#allocation2 + $0x68] sm:$0xff]  ;;  %v94_v55 = vld [vmem:[#allocation2 + $0x60] sm:$0xff] }
  0x47   :  { %562 = vmatprep.subr.mxu0 %v120_v19  ;;  %659 = vmatpush3.msra.mxu1 %v260_v33  ;;  %v97_v56 = vld [vmem:[#allocation2 + $0x78] sm:$0xff]  ;;  %v96_v57 = vld [vmem:[#allocation2 + $0x70] sm:$0xff]  ;;  %v255_v58 = vld [vmem:[#allocation7 + $0x28] sm:$0xff] }
  0x48   :  { %563 = vmatpush3.msra.mxu0 %v104_v22  ;;  %660 = vmatprep.subr.mxu1 %v259_v36  ;;  %v254_v59 = vld [vmem:[#allocation7 + $0x20] sm:$0xff]  ;;  %v253_v60 = vld [vmem:[#allocation7 + $0x18] sm:$0xff]  ;;  %v252_v61 = vld [vmem:[#allocation7 + $0x10] sm:$0xff] }
  0x49   :  { %564 = vmatprep.subr.mxu0 %v119_v23  ;;  %661 = vmatpush3.msra.mxu1 %v259_v36  ;;  %v251_v62 = vld [vmem:[#allocation7 + $0x8] sm:$0xff]  ;;  %v250_v63 = vld [vmem:[#allocation7] sm:$0xff]  ;;  %v401_v0 = vld [vmem:[#allocation8 + $0x78] sm:$0xff] }
  0x4a   :  { %565 = vmatpush3.msra.mxu0 %v103_v25  ;;  %662 = vmatprep.subr.mxu1 %v258_v39  ;;  %v400_v1 = vld [vmem:[#allocation8 + $0x70] sm:$0xff]  ;;  %v399_v2 = vld [vmem:[#allocation8 + $0x68] sm:$0xff]  ;;  %v398_v3 = vld [vmem:[#allocation8 + $0x60] sm:$0xff] }
  0x4b   :  { %566 = vmatprep.subr.mxu0 %v118_v26  ;;  %663 = vmatpush3.msra.mxu1 %v258_v39  ;;  %v955_v4 = vld [vmem:[#allocation8 + $0x58] sm:$0xff]  ;;  %v957_v5 = vld [vmem:[#allocation8 + $0x50] sm:$0xff]  ;;  %v961_v6 = vld [vmem:[#allocation8 + $0x48] sm:$0xff] }
  0x4c   :  { %567 = vmatpush3.msra.mxu0 %v102_v28  ;;  %664 = vmatprep.subr.mxu1 %v257_v42  ;;  %v965_v7 = vld [vmem:[#allocation8 + $0x40] sm:$0xff]  ;;  %v969_v8 = vld [vmem:[#allocation8 + $0x38] sm:$0xff]  ;;  %v973_v9 = vld [vmem:[#allocation8 + $0x30] sm:$0xff] }
  0x4d   :  { %568 = vmatprep.subr.mxu0 %v117_v29  ;;  %665 = vmatpush3.msra.mxu1 %v257_v42  ;;  %v977_v10 = vld [vmem:[#allocation8 + $0x28] sm:$0xff]  ;;  %v981_v11 = vld [vmem:[#allocation8 + $0x20] sm:$0xff] }
  0x4e   :  { %569 = vmatpush3.msra.mxu0 %v101_v31  ;;  %666 = vmatprep.subr.mxu1 %v256_v44  ;;  %v541_v14 = vld [vmem:[%s1020_s2] ss:$0 sm:$0xff] }
  0x4f   :  { %570 = vmatprep.subr.mxu0 %v116_v32  ;;  %667 = vmatpush3.msra.mxu1 %v256_v44 }
  0x50   :  { %571 = vmatpush3.msra.mxu0 %v100_v34  ;;  %668 = vmatprep.subr.mxu1 %v255_v58 }
  0x51   :  { %572 = vmatprep.subr.mxu0 %v115_v35  ;;  %669 = vmatpush3.msra.mxu1 %v255_v58 }
  0x52   :  { %573 = vmatpush3.msra.mxu0 %v99_v37  ;;  %670 = vmatprep.subr.mxu1 %v254_v59 }
  0x53   :  { %574 = vmatprep.subr.mxu0 %v114_v38  ;;  %671 = vmatpush3.msra.mxu1 %v254_v59 }
  0x54   :  { %575 = vmatpush3.msra.mxu0 %v98_v40  ;;  %672 = vmatprep.subr.mxu1 %v253_v60 }
  0x55   :  { %202 = vmatmul.mubr.f32.vlgmr.msra.gmra.mxu0 %v82_v41  ;;  %673 = vmatpush3.msra.mxu1 %v253_v60 }
  0x56   :  { %206 = vmatprep.mubr.f32.mxu0 %v85_v43  ;;  %674 = vmatprep.subr.mxu1 %v252_v61 }
  0x57   :  { %675 = vmatpush3.msra.mxu1 %v252_v61  ;;  %692 = vmatprep.subr.mxu0 %v401_v0 }
  0x58   :  { %676 = vmatprep.subr.mxu1 %v251_v62  ;;  %693 = vmatpush3.msra.mxu0 %v401_v0 }
  0x59   :  { %207 = vmatmul.mubr.f32.gmra.mxu0 %v84_v45  ;;  %677 = vmatpush3.msra.mxu1 %v251_v62 }
  0x5a   :  { %211 = vmatprep.mubr.f32.mxu0 %v87_v46  ;;  %678 = vmatprep.subr.mxu1 %v250_v63 }
  0x5b   :  { %679 = vmatpush3.msra.mxu1 %v250_v63  ;;  %694 = vmatprep.subr.mxu0 %v400_v1 }
  0x5c   :  { %736 = vmatprep.subr.mxu1 %v401_v0  ;;  %695 = vmatpush3.msra.mxu0 %v400_v1 }
  0x5d   :  { %212 = vmatmul.mubr.f32.gmra.mxu0 %v86_v47  ;;  %696 = vmatprep.subr.mxu0 %v399_v2 }
  0x5e   :  { %216 = vmatprep.mubr.f32.mxu0 %v89_v48  ;;  %697 = vmatpush3.msra.mxu0 %v399_v2 }
  0x5f   :  { %698 = vmatprep.subr.mxu0 %v398_v3 }
  0x60   :  { %699 = vmatpush3.msra.mxu0 %v398_v3 }
  0x61   :  { %217 = vmatmul.mubr.f32.gmra.mxu0 %v88_v49  ;;  %700 = vmatprep.subr.mxu0 %v955_v4 }
  0x62   :  { %221 = vmatprep.mubr.f32.mxu0 %v91_v50  ;;  %701 = vmatpush3.msra.mxu0 %v955_v4 }
  0x63   :  { %702 = vmatprep.subr.mxu0 %v957_v5 }
  0x64   :  { %703 = vmatpush3.msra.mxu0 %v957_v5 }
  0x65   :  { %222 = vmatmul.mubr.f32.gmra.mxu0 %v90_v51  ;;  %704 = vmatprep.subr.mxu0 %v961_v6 }
  0x66   :  { %226 = vmatprep.mubr.f32.mxu0 %v93_v52  ;;  %705 = vmatpush3.msra.mxu0 %v961_v6 }
  0x67   :  { %706 = vmatprep.subr.mxu0 %v965_v7 }
  0x68   :  { %707 = vmatpush3.msra.mxu0 %v965_v7 }
  0x69   :  { %227 = vmatmul.mubr.f32.gmra.mxu0 %v92_v53  ;;  %708 = vmatprep.subr.mxu0 %v969_v8  ;;  %v389_v53 = vld [vmem:[#allocation8 + $0x18] sm:$0xff] }
  0x6a   :  { %231 = vmatprep.mubr.f32.mxu0 %v95_v54  ;;  %709 = vmatpush3.msra.mxu0 %v969_v8  ;;  %v388_v54 = vld [vmem:[#allocation8 + $0x10] sm:$0xff] }
  0x6b   :  { %710 = vmatprep.subr.mxu0 %v973_v9 }
  0x6c   :  { %711 = vmatpush3.msra.mxu0 %v973_v9 }
  0x6d   :  { %232 = vmatmul.mubr.f32.gmra.mxu0 %v94_v55  ;;  %712 = vmatprep.subr.mxu0 %v977_v10  ;;  %v387_v55 = vld [vmem:[#allocation8 + $0x8] sm:$0xff] }
  0x6e   :  { %236 = vmatprep.mubr.f32.mxu0 %v97_v56  ;;  %713 = vmatpush3.msra.mxu0 %v977_v10  ;;  %v386_v56 = vld [vmem:[#allocation8] sm:$0xff] }
  0x6f   :  { %714 = vmatprep.subr.mxu0 %v981_v11 }
  0x70   :  { %715 = vmatpush3.msra.mxu0 %v981_v11 }
  0x71   :  { %237 = vmatmul.mubr.f32.gmra.mxu0 %v96_v57  ;;  %716 = vmatprep.subr.mxu0 %v389_v53  ;;  %v542_v57 = vld [vmem:[%s1022_s4] ss:$0 sm:$0xff] }
  0x72   :  { %717 = vmatpush3.msra.mxu0 %v389_v53 }
  0x73   :  { %718 = vmatprep.subr.mxu0 %v388_v54 }
  0x74   :  { %719 = vmatpush3.msra.mxu0 %v388_v54 }
  0x75   :  { %720 = vmatprep.subr.mxu0 %v387_v55 }
  0x76   :  { %721 = vmatpush3.msra.mxu0 %v387_v55 }
  0x77   :  { %722 = vmatprep.subr.mxu0 %v386_v56 }
  0x78   :  { %723 = vmatpush3.msra.mxu0 %v386_v56 }
 0x115   :  { %v576_v12 = vpop.f32.mrf.mxu0 }
 0x117   :  { %v577_v13 = vpop.f32.mrf.mxu0 }
 0x118   :  { %v578_v15 = vadd.f32 %v577_v13, %v576_v12 }
 0x119   :  { %v579_v16 = vpop.f32.mrf.mxu0 }
 0x11a   :  { %v204_v17 = vadd.f32 %v578_v15, %v541_v14 }
 0x11b   :  { %v580_v18 = vpop.f32.mrf.mxu0 }
 0x11c   :  { %v581_v19 = vadd.f32 %v580_v18, %v579_v16  ;;  %v242_v20 = vmax.f32 %v204_v17, 0.0  ;;  %v543_v18 = vld [vmem:[%s1024_s6] ss:$0 sm:$0xff]  ;;  %s893_s6 = smov [#allocation10]  }
 0x11d   :  { %v582_v21 = vpop.f32.mrf.mxu0  ;;  %s527_s25 = sshll.u32 %s893_s6, 4  ;;  %s528_s25 = int_to_ptr.vmem [resolvable:$true] %s527_s25 }
 0x11e   :  { %v209_v22 = vadd.f32 %v581_v19, %v541_v14  ;;  %680 = vmatprep.mubr.f32.mxu1 %v242_v20  ;;  %s857_s26 = scalar_lea.vmem %s528_s25, 1024  ;;  %p862_p7 = scmp.lt.s32.totalorder %s528_s25, %s528_s25 }
 0x11f   :  { %v583_v23 = vpop.f32.mrf.mxu0  ;;  %p858_p6 = scmp.ne.s32.totalorder %s528_s25, %s857_s26  ;;  %p863_p8 = scmp.lt.s32.totalorder %s857_s26, %s857_s26 }
 0x120   :  { %v243_v24 = vmax.f32 %v209_v22, 0.0  ;;  %v584_v25 = vadd.f32 %v583_v23, %v582_v21 }
 0x121   :  { %v585_v26 = vpop.f32.mrf.mxu0  ;;  %p864_p9 = por %p863_p8, %p862_p7 }
 0x122   :  { %v214_v27 = vadd.f32 %v584_v25, %v541_v14  ;;  %681 = vmatmul.mubr.f32.vlgmr.msra.gmra.mxu1 %v243_v24 }
 0x123   :  { %v586_v28 = vpop.f32.mrf.mxu0  ;;  %752 = vmatpush3.msra.mxu1 %v401_v0  ;;  %p865_p10 = pnand %p864_p9, %p858_p6 }
 0x124   :  { %v244_v29 = vmax.f32 %v214_v27, 0.0  ;;  %v587_v30 = vadd.f32 %v586_v28, %v585_v26  ;;  %737 = vmatprep.subr.mxu1 %v400_v1 }
 0x125   :  { %v588_v31 = vpop.f32.mrf.mxu0  ;;  %753 = vmatpush3.msra.mxu1 %v400_v1 }
 0x126   :  { %v219_v32 = vadd.f32 %v587_v30, %v541_v14  ;;  %683 = vmatprep.mubr.f32.mxu1 %v244_v29  ;;  %738 = vmatprep.subr.mxu1 %v399_v2 }
 0x127   :  { %v589_v33 = vpop.f32.mrf.mxu0  ;;  %754 = vmatpush3.msra.mxu1 %v399_v2 }
 0x128   :  { %v245_v34 = vmax.f32 %v219_v32, 0.0  ;;  %v590_v35 = vadd.f32 %v589_v33, %v588_v31  ;;  %739 = vmatprep.subr.mxu1 %v398_v3 }
 0x129   :  { %v591_v36 = vpop.f32.mrf.mxu0  ;;  %755 = vmatpush3.msra.mxu1 %v398_v3 }
 0x12a   :  { %v224_v37 = vadd.f32 %v590_v35, %v541_v14  ;;  %684 = vmatmul.mubr.f32.gmra.mxu1 %v245_v34  ;;  %740 = vmatprep.subr.mxu1 %v955_v4 }
 0x12b   :  { %v592_v38 = vpop.f32.mrf.mxu0  ;;  %756 = vmatpush3.msra.mxu1 %v955_v4 }
 0x12c   :  { %v246_v39 = vmax.f32 %v224_v37, 0.0  ;;  %v593_v40 = vadd.f32 %v592_v38, %v591_v36  ;;  %741 = vmatprep.subr.mxu1 %v957_v5 }
 0x12d   :  { %v594_v41 = vpop.f32.mrf.mxu0  ;;  %757 = vmatpush3.msra.mxu1 %v957_v5 }
 0x12e   :  { %v229_v42 = vadd.f32 %v593_v40, %v541_v14  ;;  %686 = vmatprep.mubr.f32.mxu1 %v246_v39  ;;  %742 = vmatprep.subr.mxu1 %v961_v6 }
 0x12f   :  { %v595_v43 = vpop.f32.mrf.mxu0  ;;  %758 = vmatpush3.msra.mxu1 %v961_v6 }
 0x130   :  { %v247_v44 = vmax.f32 %v229_v42, 0.0  ;;  %v596_v45 = vadd.f32 %v595_v43, %v594_v41  ;;  %743 = vmatprep.subr.mxu1 %v965_v7 }
 0x131   :  { %v597_v46 = vpop.f32.mrf.mxu0  ;;  %759 = vmatpush3.msra.mxu1 %v965_v7 }
 0x132   :  { %v234_v47 = vadd.f32 %v596_v45, %v541_v14  ;;  %687 = vmatmul.mubr.f32.gmra.mxu1 %v247_v44  ;;  %744 = vmatprep.subr.mxu1 %v969_v8 }
 0x133   :  { %v598_v48 = vpop.f32.mrf.mxu0  ;;  %760 = vmatpush3.msra.mxu1 %v969_v8 }
 0x134   :  { %v248_v49 = vmax.f32 %v234_v47, 0.0  ;;  %v599_v50 = vadd.f32 %v598_v48, %v597_v46  ;;  %745 = vmatprep.subr.mxu1 %v973_v9 }
 0x135   :  { %761 = vmatpush3.msra.mxu1 %v973_v9 }
 0x136   :  { %v239_v51 = vadd.f32 %v599_v50, %v541_v14  ;;  %689 = vmatprep.mubr.f32.mxu1 %v248_v49  ;;  %746 = vmatprep.subr.mxu1 %v977_v10 }
 0x137   :  { %762 = vmatpush3.msra.mxu1 %v977_v10 }
 0x138   :  { %v249_v52 = vmax.f32 %v239_v51, 0.0  ;;  %747 = vmatprep.subr.mxu1 %v981_v11 }
 0x139   :  { %763 = vmatpush3.msra.mxu1 %v981_v11 }
 0x13a   :  { %690 = vmatmul.mubr.f32.gmra.mxu1 %v249_v52  ;;  %748 = vmatprep.subr.mxu1 %v389_v53 }
 0x13b   :  { %764 = vmatpush3.msra.mxu1 %v389_v53 }
 0x13c   :  { %749 = vmatprep.subr.mxu1 %v388_v54 }
 0x13d   :  { %765 = vmatpush3.msra.mxu1 %v388_v54 }
 0x13e   :  { %750 = vmatprep.subr.mxu1 %v387_v55 }
 0x13f   :  { %766 = vmatpush3.msra.mxu1 %v387_v55 }
 0x140   :  { %751 = vmatprep.subr.mxu1 %v386_v56 }
 0x141   :  { %767 = vmatpush3.msra.mxu1 %v386_v56 }
 0x1e2   :  { %v682_v58 = vpop.f32.mrf.mxu1 }
 0x1e3   :  { %v345_v59 = vadd.f32 %v682_v58, %v542_v57 }
 0x1e4   :  { %v339_v60 = vpop.f32.mrf.mxu1 }
 0x1e5   :  { %v340_v61 = vadd.f32 %v542_v57, %v339_v60  ;;  %v379_v63 = vmax.f32 %v345_v59, 0.0 }
 0x1e7   :  { %v378_v62 = vmax.f32 %v340_v61, 0.0 }
 0x1e9   :  { %724 = vmatprep.mubr.f32.mxu0 %v378_v62 }
 0x1ea   :  { %v685_v0 = vpop.f32.mrf.mxu1  ;;  %725 = vmatmul.mubr.f32.vlgmr.msra.gmra.mxu0 %v379_v63 }
 0x1eb   :  { %v355_v1 = vadd.f32 %v685_v0, %v542_v57 }
 0x1ec   :  { %v349_v2 = vpop.f32.mrf.mxu1 }
 0x1ed   :  { %v350_v3 = vadd.f32 %v542_v57, %v349_v2  ;;  %v381_v5 = vmax.f32 %v355_v1, 0.0 }
 0x1ef   :  { %v380_v4 = vmax.f32 %v350_v3, 0.0 }
 0x1f1   :  { %727 = vmatprep.mubr.f32.mxu0 %v380_v4 }
 0x1f2   :  { %v688_v6 = vpop.f32.mrf.mxu1  ;;  %728 = vmatmul.mubr.f32.gmra.mxu0 %v381_v5 }
 0x1f3   :  { %v365_v7 = vadd.f32 %v688_v6, %v542_v57 }
 0x1f4   :  { %v359_v8 = vpop.f32.mrf.mxu1 }
 0x1f5   :  { %v360_v9 = vadd.f32 %v542_v57, %v359_v8  ;;  %v383_v11 = vmax.f32 %v365_v7, 0.0 }
 0x1f7   :  { %v382_v10 = vmax.f32 %v360_v9, 0.0 }
 0x1f9   :  { %730 = vmatprep.mubr.f32.mxu1 %v382_v10 }
 0x1fa   :  { %v691_v12 = vpop.f32.mrf.mxu1  ;;  %731 = vmatmul.mubr.f32.vlgmr.msra.gmra.mxu1 %v383_v11 }
 0x1fb   :  { %v375_v13 = vadd.f32 %v691_v12, %v542_v57 }
 0x1fc   :  { %v369_v14 = vpop.f32.mrf.mxu1 }
 0x1fd   :  { %v370_v15 = vadd.f32 %v542_v57, %v369_v14  ;;  %v385_v17 = vmax.f32 %v375_v13, 0.0 }
 0x1ff   :  { %v384_v16 = vmax.f32 %v370_v15, 0.0 }
 0x201   :  { %733 = vmatprep.mubr.f32.mxu1 %v384_v16 }
 0x202   :  { %734 = vmatmul.mubr.f32.gmra.mxu1 %v385_v17 }
 0x2aa   :  { %v726_v19 = vpop.f32.mrf.mxu0 }
 0x2ab   :  { %v481_v20 = vadd.f32 %v726_v19, %v543_v18 }
 0x2ac   :  { %v475_v21 = vpop.f32.mrf.mxu0 }
 0x2ad   :  { %515 = vst [vmem:[#allocation10 + $0x8] sm:$0xff] %v481_v20  ;;  %v476_v22 = vadd.f32 %v543_v18, %v475_v21 }
 0x2af   :  { %514 = vst [vmem:[#allocation10] sm:$0xff] %v476_v22 }
 0x2b2   :  { %v729_v23 = vpop.f32.mrf.mxu0 }
 0x2b3   :  { %v491_v24 = vadd.f32 %v729_v23, %v543_v18 }
 0x2b4   :  { %v485_v25 = vpop.f32.mrf.mxu0 }
 0x2b5   :  { %517 = vst [vmem:[#allocation10 + $0x18] sm:$0xff] %v491_v24  ;;  %v486_v26 = vadd.f32 %v543_v18, %v485_v25 }
 0x2b7   :  { %516 = vst [vmem:[#allocation10 + $0x10] sm:$0xff] %v486_v26 }
 0x2ba   :  { %v732_v27 = vpop.f32.mrf.mxu1 }
 0x2bb   :  { %v501_v28 = vadd.f32 %v732_v27, %v543_v18 }
 0x2bc   :  { %v495_v29 = vpop.f32.mrf.mxu1 }
 0x2bd   :  { %519 = vst [vmem:[#allocation10 + $0x28] sm:$0xff] %v501_v28  ;;  %v496_v30 = vadd.f32 %v543_v18, %v495_v29 }
 0x2bf   :  { %518 = vst [vmem:[#allocation10 + $0x20] sm:$0xff] %v496_v30 }
 0x2c2   :  { %v735_v31 = vpop.f32.mrf.mxu1 }
 0x2c3   :  { %v511_v32 = vadd.f32 %v735_v31, %v543_v18 }
 0x2c4   :  { %v505_v33 = vpop.f32.mrf.mxu1 }
 0x2c5   :  { %521 = vst [vmem:[#allocation10 + $0x38] sm:$0xff] %v511_v32  ;;  %v506_v34 = vadd.f32 %v543_v18, %v505_v33 }
 0x2c7   :  { %520 = vst [vmem:[#allocation10 + $0x30] sm:$0xff] %v506_v34 }
 0x2c8   :  { %868 = shalt.err (!%p865_p10)
}
 0x2c9   :  { %533 = dma.vmem_to_hbm [thread:$0]  %s528_s25, 1024, %s1025_s7, [#allocation4], %s886_s27, %s886_s27, %s887_s28  }
 0x2ca   :  { %883 = dma.done.wait [#allocation4], 1024  }
 0x2cb   :  { %884 = vsyncadd [#allocation4], 4294966272 }
 0x2cc   :  { %537 = vsyncpa [#allocation3], 1 }
 0x2cd   :  { %538 = vsyncpa [#allocation6], 1 }
 0x2ce   :  { %539 = vsyncpa [#allocation9], 1 }
 0x2cf   :  { %540 = vsyncpa [#allocation4], 1 }

</bundles_post_ra>
